<compile_context>
chip_gen: v7x
topology: tpu7x:2x2x1
jax: 0.10.0
libtpu: 0.0.40
codegen_flags: <defaults>
</compile_context>

<pallas_src>
import functools

import jax
import jax.numpy as jnp
from jax import lax
from jax.experimental import pallas as pl
from jax.experimental.pallas import tpu as pltpu


def _round_up(x, m):
    return ((x + m - 1) // m) * m


def _make_fused_kernel(n_layers, K, T_real, tT, halo1, compute_dtype, gelu_approx):
    """Fused frontend kernel for one (batch, time-tile) grid point."""
    P = (K - 1) // 2
    Lwin = tT + 2 * halo1
    inv_sqrt2 = 0.7071067811865476

    def _gelu(y):
        if gelu_approx:
            c = 0.7978845608028654
            return 0.5 * y * (1.0 + jnp.tanh(c * (y + 0.044715 * y * y * y)))
        return 0.5 * y * (1.0 + lax.erf(y * inv_sqrt2))

    def _bias_gelu_bn(y, aff_ref):
        y = y + aff_ref[0:1, :]                       # conv bias
        y = _gelu(y)                                  # GELU (f32)
        return y * aff_ref[1:2, :] + aff_ref[2:3, :]  # folded BatchNorm (eval)

    def kernel(win_ref, *refs):
        # win_ref : (Lwin, K*C_in)  haloed, im2col'd input window (compute_dtype)
        # refs    : (w0_flat, aff0, w1_taps, aff1, ..., o_ref)
        #   w0_flat : (K*C_in, H)   tap-major flattened layer-1 weight
        #   wi_taps : (K, H, H)     per-tap weights for layers >= 2
        #   aff_i   : (3, H) f32    [bias; bn_scale; bn_shift]
        #   o_ref   : (tT, H)
        o_ref = refs[-1]
        params = refs[:-1]
        t = pl.program_id(1)

        # Row-validity mask over window rows (global row = t*tT - halo1 + i).
        # Rows outside [0, T_real) must act as the NEXT conv's 'same' zero padding
        # (PyTorch pads each layer's input).  Computed ONCE per tile; intermediate
        # layers just multiply by a static slice of it.
        row0 = t * tT - halo1
        ridx = lax.broadcasted_iota(jnp.int32, (Lwin, 1), 0) + row0
        mask = ((ridx >= 0) & (ridx < T_real)).astype(jnp.float32)

        # ---- layer 1: single matmul, contraction K*C_in (im2col done in wrapper)
        w0_ref, aff0_ref = params[0], params[1]
        y = jnp.dot(win_ref[...], w0_ref[...], preferred_element_type=jnp.float32)
        y = _bias_gelu_bn(y, aff0_ref)
        L = Lwin
        off = 0  # window-coordinate offset of y's row 0

        # ---- layers 2..n: K per-tap accumulating matmuls (contraction = H)
        for li in range(1, n_layers):
            w_ref, aff_ref = params[2 * li], params[2 * li + 1]
            # zero out-of-range rows of the previous activation (per-layer padding)
            h = (y * mask[off:off + L]).astype(compute_dtype)
            L_out = L - (K - 1)
            acc = jnp.dot(h[0:L_out, :], w_ref[0],
                          preferred_element_type=jnp.float32)
            for k in range(1, K):
                acc = acc + jnp.dot(h[k:k + L_out, :], w_ref[k],
                                    preferred_element_type=jnp.float32)
            y = _bias_gelu_bn(acc, aff_ref)
            off += P
            L = L_out

        o_ref[...] = y.astype(o_ref.dtype)

    return kernel


def ecog_frontend_fused(x, layer_params, *, time_tile=None, eps=1e-5,
                        compute_dtype=jnp.bfloat16, gelu_approx=False):
    """x: (B, T, C_in) time-major -> (B, T, H).  Single fused pallas_call."""
    B, T, C_in = x.shape
    n_layers = len(layer_params)
    H, _, K = layer_params[0][0].shape          # PyTorch Conv1d weight: (out, in, k)
    P = (K - 1) // 2                            # per-layer 'same' pad per side
    halo = n_layers * P                         # raw-input halo for the fused stack
    halo1 = (n_layers - 1) * P                  # halo of the layer-1 *output*

    # Generation-aware VMEM budget / default tile (v7x: 64 MiB; v5e/v6e: 128 MiB).
    try:
        vmem_cap = int(pltpu.get_tpu_info().vmem_capacity_bytes)
    except Exception:
        vmem_cap = 64 * 1024 * 1024
    vmem_limit = min(int(vmem_cap * 0.8), 112 * 1024 * 1024)
    default_tile = 1024 if vmem_cap >= 96 * 1024 * 1024 else 512

    # Time tile: multiple of 8 sublanes.  Tiny tiles (e.g. 8) are for tests only.
    tT = time_tile if time_tile is not None else default_tile
    tT = max(8, _round_up(min(tT, _round_up(T, 8)), 8))
    nT = -(-T // tT)
    T_out = nT * tT
    T_tot = T_out + 2 * halo
    Lwin = tT + 2 * halo1
    T_col = T_out + 2 * halo1
    KC = K * C_in

    # Wrapper-side prep on the tiny C_in-wide input (cheap XLA ops):
    #   1) single zero pad, 2) im2col to lane-dense K*C_in columns,
    #   3) per-tile haloed windows so the kernel's input block never overlaps.
    x_pad = jnp.pad(x, ((0, 0), (halo, T_out - T + halo), (0, 0)))
    x_col = jnp.concatenate([x_pad[:, k:k + T_col, :] for k in range(K)], axis=2)
    idx = (jnp.arange(nT) * tT)[:, None] + jnp.arange(Lwin)[None, :]   # (nT, Lwin)
    win = jnp.take(x_col, idx, axis=1).astype(compute_dtype)           # (B,nT,Lwin,KC)

    flat_inputs = [win]
    in_specs = [pl.BlockSpec((None, None, Lwin, KC), lambda b, t: (b, t, 0, 0))]

    for li, (w, b_, gamma, beta, rm, rv) in enumerate(layer_params):
        Hl, Cl, Kl = w.shape
        scale = gamma * lax.rsqrt(rv + eps)
        shift = beta - rm * scale
        aff = jnp.stack([b_, scale, shift], axis=0).astype(jnp.float32)   # (3, H)
        if li == 0:
            # tap-major flatten: row k*C + c matches the wrapper im2col column order
            w_in = jnp.transpose(w, (2, 1, 0)).reshape(Kl * Cl, Hl).astype(compute_dtype)
            w_spec = pl.BlockSpec((Kl * Cl, Hl), lambda b, t: (0, 0))
        else:
            w_in = jnp.transpose(w, (2, 1, 0)).astype(compute_dtype)       # (K, C, H)
            w_spec = pl.BlockSpec((Kl, Cl, Hl), lambda b, t: (0, 0, 0))
        flat_inputs += [w_in, aff]
        in_specs += [w_spec, pl.BlockSpec((3, Hl), lambda b, t: (0, 0))]

    # Advisory cost estimate so XLA schedules neighbours around the custom call.
    flops = sum(2 * B * T_out * int(w.shape[2]) * int(w.shape[1]) * int(w.shape[0])
                for (w, *_r) in layer_params)
    transcendentals = n_layers * B * T_out * H
    bytes_accessed = (int(win.size) * win.dtype.itemsize
                      + B * T_out * H * x.dtype.itemsize
                      + sum(int(w.size) * jnp.dtype(compute_dtype).itemsize
                            for (w, *_r) in layer_params))
    cost = pl.CostEstimate(flops=int(flops), transcendentals=int(transcendentals),
                           bytes_accessed=int(bytes_accessed))

    kernel = _make_fused_kernel(n_layers=n_layers, K=K, T_real=T, tT=tT, halo1=halo1,
                                compute_dtype=compute_dtype, gelu_approx=gelu_approx)

    out = pl.pallas_call(
        kernel,
        out_shape=jax.ShapeDtypeStruct((B, T_out, H), x.dtype),
        grid_spec=pltpu.PrefetchScalarGridSpec(
            num_scalar_prefetch=0,
            grid=(B, nT),
            in_specs=in_specs,
            out_specs=pl.BlockSpec((None, tT, H), lambda b, t: (b, t, 0)),
        ),
        compiler_params=pltpu.CompilerParams(
            dimension_semantics=("parallel", "parallel"),
            vmem_limit_bytes=vmem_limit,
        ),
        cost_estimate=cost,
    )(*flat_inputs)
    return out[:, :T, :]


def init_params(key, n_electrodes, hidden_size, n_layers=3, kernel_size=9):
    """Deterministic synthetic parameters mirroring the PyTorch module shapes."""
    params = []
    in_ch = n_electrodes
    for _ in range(n_layers):
        key, kw, kb, kg, kbt, km, kv = jax.random.split(key, 7)
        w = 0.1 * jax.random.normal(kw, (hidden_size, in_ch, kernel_size), jnp.float32)
        b = 0.1 * jax.random.normal(kb, (hidden_size,), jnp.float32)
        gamma = 1.0 + 0.1 * jax.random.normal(kg, (hidden_size,), jnp.float32)
        beta = 0.1 * jax.random.normal(kbt, (hidden_size,), jnp.float32)
        running_mean = 0.05 * jax.random.normal(km, (hidden_size,), jnp.float32)
        running_var = 1.0 + 0.1 * jax.random.uniform(kv, (hidden_size,), jnp.float32)
        params.append((w, b, gamma, beta, running_mean, running_var))
        in_ch = hidden_size
    return params


@functools.partial(jax.jit, static_argnames=("time_tile", "compute_dtype", "gelu_approx"))
def ecog_frontend(x, params, time_tile=None, compute_dtype="bfloat16", gelu_approx=False):
    cdt = {"float32": jnp.float32, "bfloat16": jnp.bfloat16}[compute_dtype]
    return ecog_frontend_fused(x, params, time_tile=time_tile,
                               compute_dtype=cdt, gelu_approx=gelu_approx)


def _reference(x, params, eps=1e-5):
    """Pure-JAX reference (eval-mode semantics) for sanity checking."""
    h = jnp.transpose(x, (0, 2, 1))  # (B, C, T) -- NCW, like PyTorch
    for (w, b, gamma, beta, rm, rv) in params:
        h = lax.conv_general_dilated(
            h, w, window_strides=(1,), padding="SAME",
            dimension_numbers=("NCH", "OIH", "NCH"))
        h = h + b[None, :, None]
        h = 0.5 * h * (1.0 + lax.erf(h / jnp.sqrt(2.0)))
        h = (h - rm[None, :, None]) / jnp.sqrt(rv[None, :, None] + eps)
        h = h * gamma[None, :, None] + beta[None, :, None]
    return jnp.transpose(h, (0, 2, 1))  # back to (B, T, H)


if __name__ == "__main__":
    B, T = 2, 16
    n_electrodes, hidden_size = 4, 32

    key = jax.random.PRNGKey(0)
    key, kx = jax.random.split(key)
    x = jax.random.normal(kx, (B, T, n_electrodes), jnp.float32)
    params = init_params(key, n_electrodes, hidden_size, n_layers=3, kernel_size=9)

    ref = _reference(x, params)

    # f32 path: exact 1e-4 parity with the erf/f32 reference.
    # time_tile=8 -> grid (B=2, nT=2): exercises halo windows + boundary masking.
    out32 = ecog_frontend(x, params, time_tile=8, compute_dtype="float32")
    out32 = jax.block_until_ready(out32)
    assert out32.shape == (B, T, hidden_size), out32.shape
    err32 = float(jnp.max(jnp.abs(out32 - ref)))
    assert jnp.allclose(out32, ref, atol=1e-4, rtol=1e-4), err32

    # bf16 MXU path (the performance default): looser tolerance.
    outbf = ecog_frontend(x, params, time_tile=8)  # compute_dtype defaults to bfloat16
    outbf = jax.block_until_ready(outbf)
    errbf = float(jnp.max(jnp.abs(outbf.astype(jnp.float32) - ref)))
    assert outbf.shape == (B, T, hidden_size), outbf.shape
    assert errbf < 1e-1, errbf

    print("KERNEL_OK")
</pallas_src>

<mosaic_0001>
module attributes {stable_mosaic.version = 11 : i64} {
  func.func @kernel(%arg0: i32, %arg1: i32, %arg2: memref<1x1x24x36xf32, #tpu.memory_space<vmem>>, %arg3: memref<36x32xf32, #tpu.memory_space<vmem>>, %arg4: memref<3x32xf32, #tpu.memory_space<vmem>>, %arg5: memref<9x32x32xf32, #tpu.memory_space<vmem>>, %arg6: memref<3x32xf32, #tpu.memory_space<vmem>>, %arg7: memref<9x32x32xf32, #tpu.memory_space<vmem>>, %arg8: memref<3x32xf32, #tpu.memory_space<vmem>>, %arg9: memref<1x8x32xf32, #tpu.memory_space<vmem>>) attributes {dimension_semantics = [#tpu.dimension_semantics<parallel>, #tpu.dimension_semantics<parallel>], iteration_bounds = array<i64: 2, 2>, scalar_prefetch = 0 : i64, scratch_operands = 0 : i64, tpu.core_type = #tpu.core_type<tc>, window_params = [{transform_indices = @transform_0, window_bounds = array<i64: 1, 1, 24, 36>}, {pipeline_mode = #tpu.pipeline_mode<synchronous>, transform_indices = @transform_1, window_bounds = array<i64: 36, 32>}, {pipeline_mode = #tpu.pipeline_mode<synchronous>, transform_indices = @transform_2, window_bounds = array<i64: 3, 32>}, {pipeline_mode = #tpu.pipeline_mode<synchronous>, transform_indices = @transform_3, window_bounds = array<i64: 9, 32, 32>}, {pipeline_mode = #tpu.pipeline_mode<synchronous>, transform_indices = @transform_4, window_bounds = array<i64: 3, 32>}, {pipeline_mode = #tpu.pipeline_mode<synchronous>, transform_indices = @transform_5, window_bounds = array<i64: 9, 32, 32>}, {pipeline_mode = #tpu.pipeline_mode<synchronous>, transform_indices = @transform_6, window_bounds = array<i64: 3, 32>}, {transform_indices = @transform_7, window_bounds = array<i64: 1, 8, 32>}]} {
    %c8_i32 = arith.constant 8 : i32
    %0 = arith.muli %arg1, %c8_i32 : i32
    %c8_i32_0 = arith.constant 8 : i32
    %1 = arith.subi %0, %c8_i32_0 : i32
    %2 = tpu.iota {dimensions = array<i32: 0>} : vector<24x1xi32>
    %3 = vector.broadcast %1 : i32 to vector<24x1xi32>
    %4 = arith.addi %2, %3 : vector<24x1xi32>
    %c0_i32 = arith.constant 0 : i32
    %5 = vector.broadcast %c0_i32 : i32 to vector<24x1xi32>
    %6 = arith.cmpi sge, %4, %5 : vector<24x1xi32>
    %c16_i32 = arith.constant 16 : i32
    %7 = vector.broadcast %c16_i32 : i32 to vector<24x1xi32>
    %8 = arith.cmpi slt, %4, %7 : vector<24x1xi32>
    %9 = arith.andi %6, %8 : vector<24x1xi1>
    %10 = arith.extui %9 : vector<24x1xi1> to vector<24x1xi32>
    %11 = arith.sitofp %10 : vector<24x1xi32> to vector<24x1xf32>
    %c0 = arith.constant 0 : index
    %c0_1 = arith.constant 0 : index
    %c0_2 = arith.constant 0 : index
    %c0_3 = arith.constant 0 : index
    %12 = vector.load %arg2[%c0, %c0_1, %c0_2, %c0_3] : memref<1x1x24x36xf32, #tpu.memory_space<vmem>>, vector<1x1x24x36xf32>
    %13 = vector.shape_cast %12 : vector<1x1x24x36xf32> to vector<24x36xf32>
    %c0_4 = arith.constant 0 : index
    %c0_5 = arith.constant 0 : index
    %14 = vector.load %arg3[%c0_4, %c0_5] : memref<36x32xf32, #tpu.memory_space<vmem>>, vector<36x32xf32>
    %cst = arith.constant dense<0.000000e+00> : vector<24x32xf32>
    %15 = tpu.matmul %13, %14, %cst {dimension_numbers = #tpu.dot_dimension_numbers<[1], [0], [0], [1], [0, 0, 1, 1], [], []>} : vector<24x36xf32>, vector<36x32xf32>, vector<24x32xf32> -> vector<24x32xf32>
    %c0_6 = arith.constant 0 : index
    %c0_7 = arith.constant 0 : index
    %16 = vector.load %arg4[%c0_6, %c0_7] : memref<3x32xf32, #tpu.memory_space<vmem>>, vector<1x32xf32>
    %17 = vector.broadcast %16 : vector<1x32xf32> to vector<24x32xf32>
    %18 = arith.addf %15, %17 : vector<24x32xf32>
    %cst_8 = arith.constant 5.000000e-01 : f32
    %19 = vector.broadcast %cst_8 : f32 to vector<24x32xf32>
    %20 = arith.mulf %19, %18 : vector<24x32xf32>
    %cst_9 = arith.constant 0.707106769 : f32
    %21 = vector.broadcast %cst_9 : f32 to vector<24x32xf32>
    %22 = arith.mulf %18, %21 : vector<24x32xf32>
    %23 = math.erf %22 : vector<24x32xf32>
    %cst_10 = arith.constant 1.000000e+00 : f32
    %24 = vector.broadcast %cst_10 : f32 to vector<24x32xf32>
    %25 = arith.addf %24, %23 : vector<24x32xf32>
    %26 = arith.mulf %20, %25 : vector<24x32xf32>
    %c1 = arith.constant 1 : index
    %c0_11 = arith.constant 0 : index
    %27 = vector.load %arg4[%c1, %c0_11] : memref<3x32xf32, #tpu.memory_space<vmem>>, vector<1x32xf32>
    %28 = vector.broadcast %27 : vector<1x32xf32> to vector<24x32xf32>
    %29 = arith.mulf %26, %28 : vector<24x32xf32>
    %c2 = arith.constant 2 : index
    %c0_12 = arith.constant 0 : index
    %30 = vector.load %arg4[%c2, %c0_12] : memref<3x32xf32, #tpu.memory_space<vmem>>, vector<1x32xf32>
    %31 = vector.broadcast %30 : vector<1x32xf32> to vector<24x32xf32>
    %32 = arith.addf %29, %31 : vector<24x32xf32>
    %33 = vector.broadcast %11 : vector<24x1xf32> to vector<24x32xf32>
    %34 = arith.mulf %32, %33 : vector<24x32xf32>
    %35 = vector.extract_strided_slice %34 {offsets = [0, 0], sizes = [16, 32], strides = [1, 1]} : vector<24x32xf32> to vector<16x32xf32>
    %c0_13 = arith.constant 0 : index
    %c0_14 = arith.constant 0 : index
    %c0_15 = arith.constant 0 : index
    %36 = vector.load %arg5[%c0_13, %c0_14, %c0_15] : memref<9x32x32xf32, #tpu.memory_space<vmem>>, vector<1x32x32xf32>
    %37 = vector.shape_cast %36 : vector<1x32x32xf32> to vector<32x32xf32>
    %cst_16 = arith.constant dense<0.000000e+00> : vector<16x32xf32>
    %38 = tpu.matmul %35, %37, %cst_16 {dimension_numbers = #tpu.dot_dimension_numbers<[1], [0], [0], [1], [0, 0, 1, 1], [], []>} : vector<16x32xf32>, vector<32x32xf32>, vector<16x32xf32> -> vector<16x32xf32>
    %39 = vector.extract_strided_slice %34 {offsets = [1, 0], sizes = [16, 32], strides = [1, 1]} : vector<24x32xf32> to vector<16x32xf32>
    %c1_17 = arith.constant 1 : index
    %c0_18 = arith.constant 0 : index
    %c0_19 = arith.constant 0 : index
    %40 = vector.load %arg5[%c1_17, %c0_18, %c0_19] : memref<9x32x32xf32, #tpu.memory_space<vmem>>, vector<1x32x32xf32>
    %41 = vector.shape_cast %40 : vector<1x32x32xf32> to vector<32x32xf32>
    %cst_20 = arith.constant dense<0.000000e+00> : vector<16x32xf32>
    %42 = tpu.matmul %39, %41, %cst_20 {dimension_numbers = #tpu.dot_dimension_numbers<[1], [0], [0], [1], [0, 0, 1, 1], [], []>} : vector<16x32xf32>, vector<32x32xf32>, vector<16x32xf32> -> vector<16x32xf32>
    %43 = arith.addf %38, %42 : vector<16x32xf32>
    %44 = vector.extract_strided_slice %34 {offsets = [2, 0], sizes = [16, 32], strides = [1, 1]} : vector<24x32xf32> to vector<16x32xf32>
    %c2_21 = arith.constant 2 : index
    %c0_22 = arith.constant 0 : index
    %c0_23 = arith.constant 0 : index
    %45 = vector.load %arg5[%c2_21, %c0_22, %c0_23] : memref<9x32x32xf32, #tpu.memory_space<vmem>>, vector<1x32x32xf32>
    %46 = vector.shape_cast %45 : vector<1x32x32xf32> to vector<32x32xf32>
    %cst_24 = arith.constant dense<0.000000e+00> : vector<16x32xf32>
    %47 = tpu.matmul %44, %46, %cst_24 {dimension_numbers = #tpu.dot_dimension_numbers<[1], [0], [0], [1], [0, 0, 1, 1], [], []>} : vector<16x32xf32>, vector<32x32xf32>, vector<16x32xf32> -> vector<16x32xf32>
    %48 = arith.addf %43, %47 : vector<16x32xf32>
    %49 = vector.extract_strided_slice %34 {offsets = [3, 0], sizes = [16, 32], strides = [1, 1]} : vector<24x32xf32> to vector<16x32xf32>
    %c3 = arith.constant 3 : index
    %c0_25 = arith.constant 0 : index
    %c0_26 = arith.constant 0 : index
    %50 = vector.load %arg5[%c3, %c0_25, %c0_26] : memref<9x32x32xf32, #tpu.memory_space<vmem>>, vector<1x32x32xf32>
    %51 = vector.shape_cast %50 : vector<1x32x32xf32> to vector<32x32xf32>
    %cst_27 = arith.constant dense<0.000000e+00> : vector<16x32xf32>
    %52 = tpu.matmul %49, %51, %cst_27 {dimension_numbers = #tpu.dot_dimension_numbers<[1], [0], [0], [1], [0, 0, 1, 1], [], []>} : vector<16x32xf32>, vector<32x32xf32>, vector<16x32xf32> -> vector<16x32xf32>
    %53 = arith.addf %48, %52 : vector<16x32xf32>
    %54 = vector.extract_strided_slice %34 {offsets = [4, 0], sizes = [16, 32], strides = [1, 1]} : vector<24x32xf32> to vector<16x32xf32>
    %c4 = arith.constant 4 : index
    %c0_28 = arith.constant 0 : index
    %c0_29 = arith.constant 0 : index
    %55 = vector.load %arg5[%c4, %c0_28, %c0_29] : memref<9x32x32xf32, #tpu.memory_space<vmem>>, vector<1x32x32xf32>
    %56 = vector.shape_cast %55 : vector<1x32x32xf32> to vector<32x32xf32>
    %cst_30 = arith.constant dense<0.000000e+00> : vector<16x32xf32>
    %57 = tpu.matmul %54, %56, %cst_30 {dimension_numbers = #tpu.dot_dimension_numbers<[1], [0], [0], [1], [0, 0, 1, 1], [], []>} : vector<16x32xf32>, vector<32x32xf32>, vector<16x32xf32> -> vector<16x32xf32>
    %58 = arith.addf %53, %57 : vector<16x32xf32>
    %59 = vector.extract_strided_slice %34 {offsets = [5, 0], sizes = [16, 32], strides = [1, 1]} : vector<24x32xf32> to vector<16x32xf32>
    %c5 = arith.constant 5 : index
    %c0_31 = arith.constant 0 : index
    %c0_32 = arith.constant 0 : index
    %60 = vector.load %arg5[%c5, %c0_31, %c0_32] : memref<9x32x32xf32, #tpu.memory_space<vmem>>, vector<1x32x32xf32>
    %61 = vector.shape_cast %60 : vector<1x32x32xf32> to vector<32x32xf32>
    %cst_33 = arith.constant dense<0.000000e+00> : vector<16x32xf32>
    %62 = tpu.matmul %59, %61, %cst_33 {dimension_numbers = #tpu.dot_dimension_numbers<[1], [0], [0], [1], [0, 0, 1, 1], [], []>} : vector<16x32xf32>, vector<32x32xf32>, vector<16x32xf32> -> vector<16x32xf32>
    %63 = arith.addf %58, %62 : vector<16x32xf32>
    %64 = vector.extract_strided_slice %34 {offsets = [6, 0], sizes = [16, 32], strides = [1, 1]} : vector<24x32xf32> to vector<16x32xf32>
    %c6 = arith.constant 6 : index
    %c0_34 = arith.constant 0 : index
    %c0_35 = arith.constant 0 : index
    %65 = vector.load %arg5[%c6, %c0_34, %c0_35] : memref<9x32x32xf32, #tpu.memory_space<vmem>>, vector<1x32x32xf32>
    %66 = vector.shape_cast %65 : vector<1x32x32xf32> to vector<32x32xf32>
    %cst_36 = arith.constant dense<0.000000e+00> : vector<16x32xf32>
    %67 = tpu.matmul %64, %66, %cst_36 {dimension_numbers = #tpu.dot_dimension_numbers<[1], [0], [0], [1], [0, 0, 1, 1], [], []>} : vector<16x32xf32>, vector<32x32xf32>, vector<16x32xf32> -> vector<16x32xf32>
    %68 = arith.addf %63, %67 : vector<16x32xf32>
    %69 = vector.extract_strided_slice %34 {offsets = [7, 0], sizes = [16, 32], strides = [1, 1]} : vector<24x32xf32> to vector<16x32xf32>
    %c7 = arith.constant 7 : index
    %c0_37 = arith.constant 0 : index
    %c0_38 = arith.constant 0 : index
    %70 = vector.load %arg5[%c7, %c0_37, %c0_38] : memref<9x32x32xf32, #tpu.memory_space<vmem>>, vector<1x32x32xf32>
    %71 = vector.shape_cast %70 : vector<1x32x32xf32> to vector<32x32xf32>
    %cst_39 = arith.constant dense<0.000000e+00> : vector<16x32xf32>
    %72 = tpu.matmul %69, %71, %cst_39 {dimension_numbers = #tpu.dot_dimension_numbers<[1], [0], [0], [1], [0, 0, 1, 1], [], []>} : vector<16x32xf32>, vector<32x32xf32>, vector<16x32xf32> -> vector<16x32xf32>
    %73 = arith.addf %68, %72 : vector<16x32xf32>
    %74 = vector.extract_strided_slice %34 {offsets = [8, 0], sizes = [16, 32], strides = [1, 1]} : vector<24x32xf32> to vector<16x32xf32>
    %c8 = arith.constant 8 : index
    %c0_40 = arith.constant 0 : index
    %c0_41 = arith.constant 0 : index
    %75 = vector.load %arg5[%c8, %c0_40, %c0_41] : memref<9x32x32xf32, #tpu.memory_space<vmem>>, vector<1x32x32xf32>
    %76 = vector.shape_cast %75 : vector<1x32x32xf32> to vector<32x32xf32>
    %cst_42 = arith.constant dense<0.000000e+00> : vector<16x32xf32>
    %77 = tpu.matmul %74, %76, %cst_42 {dimension_numbers = #tpu.dot_dimension_numbers<[1], [0], [0], [1], [0, 0, 1, 1], [], []>} : vector<16x32xf32>, vector<32x32xf32>, vector<16x32xf32> -> vector<16x32xf32>
    %78 = arith.addf %73, %77 : vector<16x32xf32>
    %c0_43 = arith.constant 0 : index
    %c0_44 = arith.constant 0 : index
    %79 = vector.load %arg6[%c0_43, %c0_44] : memref<3x32xf32, #tpu.memory_space<vmem>>, vector<1x32xf32>
    %80 = vector.broadcast %79 : vector<1x32xf32> to vector<16x32xf32>
    %81 = arith.addf %78, %80 : vector<16x32xf32>
    %cst_45 = arith.constant 5.000000e-01 : f32
    %82 = vector.broadcast %cst_45 : f32 to vector<16x32xf32>
    %83 = arith.mulf %82, %81 : vector<16x32xf32>
    %cst_46 = arith.constant 0.707106769 : f32
    %84 = vector.broadcast %cst_46 : f32 to vector<16x32xf32>
    %85 = arith.mulf %81, %84 : vector<16x32xf32>
    %86 = math.erf %85 : vector<16x32xf32>
    %cst_47 = arith.constant 1.000000e+00 : f32
    %87 = vector.broadcast %cst_47 : f32 to vector<16x32xf32>
    %88 = arith.addf %87, %86 : vector<16x32xf32>
    %89 = arith.mulf %83, %88 : vector<16x32xf32>
    %c1_48 = arith.constant 1 : index
    %c0_49 = arith.constant 0 : index
    %90 = vector.load %arg6[%c1_48, %c0_49] : memref<3x32xf32, #tpu.memory_space<vmem>>, vector<1x32xf32>
    %91 = vector.broadcast %90 : vector<1x32xf32> to vector<16x32xf32>
    %92 = arith.mulf %89, %91 : vector<16x32xf32>
    %c2_50 = arith.constant 2 : index
    %c0_51 = arith.constant 0 : index
    %93 = vector.load %arg6[%c2_50, %c0_51] : memref<3x32xf32, #tpu.memory_space<vmem>>, vector<1x32xf32>
    %94 = vector.broadcast %93 : vector<1x32xf32> to vector<16x32xf32>
    %95 = arith.addf %92, %94 : vector<16x32xf32>
    %96 = vector.extract_strided_slice %11 {offsets = [4, 0], sizes = [16, 1], strides = [1, 1]} : vector<24x1xf32> to vector<16x1xf32>
    %97 = vector.broadcast %96 : vector<16x1xf32> to vector<16x32xf32>
    %98 = arith.mulf %95, %97 : vector<16x32xf32>
    %99 = vector.extract_strided_slice %98 {offsets = [0, 0], sizes = [8, 32], strides = [1, 1]} : vector<16x32xf32> to vector<8x32xf32>
    %c0_52 = arith.constant 0 : index
    %c0_53 = arith.constant 0 : index
    %c0_54 = arith.constant 0 : index
    %100 = vector.load %arg7[%c0_52, %c0_53, %c0_54] : memref<9x32x32xf32, #tpu.memory_space<vmem>>, vector<1x32x32xf32>
    %101 = vector.shape_cast %100 : vector<1x32x32xf32> to vector<32x32xf32>
    %cst_55 = arith.constant dense<0.000000e+00> : vector<8x32xf32>
    %102 = tpu.matmul %99, %101, %cst_55 {dimension_numbers = #tpu.dot_dimension_numbers<[1], [0], [0], [1], [0, 0, 1, 1], [], []>} : vector<8x32xf32>, vector<32x32xf32>, vector<8x32xf32> -> vector<8x32xf32>
    %103 = vector.extract_strided_slice %98 {offsets = [1, 0], sizes = [8, 32], strides = [1, 1]} : vector<16x32xf32> to vector<8x32xf32>
    %c1_56 = arith.constant 1 : index
    %c0_57 = arith.constant 0 : index
    %c0_58 = arith.constant 0 : index
    %104 = vector.load %arg7[%c1_56, %c0_57, %c0_58] : memref<9x32x32xf32, #tpu.memory_space<vmem>>, vector<1x32x32xf32>
    %105 = vector.shape_cast %104 : vector<1x32x32xf32> to vector<32x32xf32>
    %cst_59 = arith.constant dense<0.000000e+00> : vector<8x32xf32>
    %106 = tpu.matmul %103, %105, %cst_59 {dimension_numbers = #tpu.dot_dimension_numbers<[1], [0], [0], [1], [0, 0, 1, 1], [], []>} : vector<8x32xf32>, vector<32x32xf32>, vector<8x32xf32> -> vector<8x32xf32>
    %107 = arith.addf %102, %106 : vector<8x32xf32>
    %108 = vector.extract_strided_slice %98 {offsets = [2, 0], sizes = [8, 32], strides = [1, 1]} : vector<16x32xf32> to vector<8x32xf32>
    %c2_60 = arith.constant 2 : index
    %c0_61 = arith.constant 0 : index
    %c0_62 = arith.constant 0 : index
    %109 = vector.load %arg7[%c2_60, %c0_61, %c0_62] : memref<9x32x32xf32, #tpu.memory_space<vmem>>, vector<1x32x32xf32>
    %110 = vector.shape_cast %109 : vector<1x32x32xf32> to vector<32x32xf32>
    %cst_63 = arith.constant dense<0.000000e+00> : vector<8x32xf32>
    %111 = tpu.matmul %108, %110, %cst_63 {dimension_numbers = #tpu.dot_dimension_numbers<[1], [0], [0], [1], [0, 0, 1, 1], [], []>} : vector<8x32xf32>, vector<32x32xf32>, vector<8x32xf32> -> vector<8x32xf32>
    %112 = arith.addf %107, %111 : vector<8x32xf32>
    %113 = vector.extract_strided_slice %98 {offsets = [3, 0], sizes = [8, 32], strides = [1, 1]} : vector<16x32xf32> to vector<8x32xf32>
    %c3_64 = arith.constant 3 : index
    %c0_65 = arith.constant 0 : index
    %c0_66 = arith.constant 0 : index
    %114 = vector.load %arg7[%c3_64, %c0_65, %c0_66] : memref<9x32x32xf32, #tpu.memory_space<vmem>>, vector<1x32x32xf32>
    %115 = vector.shape_cast %114 : vector<1x32x32xf32> to vector<32x32xf32>
    %cst_67 = arith.constant dense<0.000000e+00> : vector<8x32xf32>
    %116 = tpu.matmul %113, %115, %cst_67 {dimension_numbers = #tpu.dot_dimension_numbers<[1], [0], [0], [1], [0, 0, 1, 1], [], []>} : vector<8x32xf32>, vector<32x32xf32>, vector<8x32xf32> -> vector<8x32xf32>
    %117 = arith.addf %112, %116 : vector<8x32xf32>
    %118 = vector.extract_strided_slice %98 {offsets = [4, 0], sizes = [8, 32], strides = [1, 1]} : vector<16x32xf32> to vector<8x32xf32>
    %c4_68 = arith.constant 4 : index
    %c0_69 = arith.constant 0 : index
    %c0_70 = arith.constant 0 : index
    %119 = vector.load %arg7[%c4_68, %c0_69, %c0_70] : memref<9x32x32xf32, #tpu.memory_space<vmem>>, vector<1x32x32xf32>
    %120 = vector.shape_cast %119 : vector<1x32x32xf32> to vector<32x32xf32>
    %cst_71 = arith.constant dense<0.000000e+00> : vector<8x32xf32>
    %121 = tpu.matmul %118, %120, %cst_71 {dimension_numbers = #tpu.dot_dimension_numbers<[1], [0], [0], [1], [0, 0, 1, 1], [], []>} : vector<8x32xf32>, vector<32x32xf32>, vector<8x32xf32> -> vector<8x32xf32>
    %122 = arith.addf %117, %121 : vector<8x32xf32>
    %123 = vector.extract_strided_slice %98 {offsets = [5, 0], sizes = [8, 32], strides = [1, 1]} : vector<16x32xf32> to vector<8x32xf32>
    %c5_72 = arith.constant 5 : index
    %c0_73 = arith.constant 0 : index
    %c0_74 = arith.constant 0 : index
    %124 = vector.load %arg7[%c5_72, %c0_73, %c0_74] : memref<9x32x32xf32, #tpu.memory_space<vmem>>, vector<1x32x32xf32>
    %125 = vector.shape_cast %124 : vector<1x32x32xf32> to vector<32x32xf32>
    %cst_75 = arith.constant dense<0.000000e+00> : vector<8x32xf32>
    %126 = tpu.matmul %123, %125, %cst_75 {dimension_numbers = #tpu.dot_dimension_numbers<[1], [0], [0], [1], [0, 0, 1, 1], [], []>} : vector<8x32xf32>, vector<32x32xf32>, vector<8x32xf32> -> vector<8x32xf32>
    %127 = arith.addf %122, %126 : vector<8x32xf32>
    %128 = vector.extract_strided_slice %98 {offsets = [6, 0], sizes = [8, 32], strides = [1, 1]} : vector<16x32xf32> to vector<8x32xf32>
    %c6_76 = arith.constant 6 : index
    %c0_77 = arith.constant 0 : index
    %c0_78 = arith.constant 0 : index
    %129 = vector.load %arg7[%c6_76, %c0_77, %c0_78] : memref<9x32x32xf32, #tpu.memory_space<vmem>>, vector<1x32x32xf32>
    %130 = vector.shape_cast %129 : vector<1x32x32xf32> to vector<32x32xf32>
    %cst_79 = arith.constant dense<0.000000e+00> : vector<8x32xf32>
    %131 = tpu.matmul %128, %130, %cst_79 {dimension_numbers = #tpu.dot_dimension_numbers<[1], [0], [0], [1], [0, 0, 1, 1], [], []>} : vector<8x32xf32>, vector<32x32xf32>, vector<8x32xf32> -> vector<8x32xf32>
    %132 = arith.addf %127, %131 : vector<8x32xf32>
    %133 = vector.extract_strided_slice %98 {offsets = [7, 0], sizes = [8, 32], strides = [1, 1]} : vector<16x32xf32> to vector<8x32xf32>
    %c7_80 = arith.constant 7 : index
    %c0_81 = arith.constant 0 : index
    %c0_82 = arith.constant 0 : index
    %134 = vector.load %arg7[%c7_80, %c0_81, %c0_82] : memref<9x32x32xf32, #tpu.memory_space<vmem>>, vector<1x32x32xf32>
    %135 = vector.shape_cast %134 : vector<1x32x32xf32> to vector<32x32xf32>
    %cst_83 = arith.constant dense<0.000000e+00> : vector<8x32xf32>
    %136 = tpu.matmul %133, %135, %cst_83 {dimension_numbers = #tpu.dot_dimension_numbers<[1], [0], [0], [1], [0, 0, 1, 1], [], []>} : vector<8x32xf32>, vector<32x32xf32>, vector<8x32xf32> -> vector<8x32xf32>
    %137 = arith.addf %132, %136 : vector<8x32xf32>
    %138 = vector.extract_strided_slice %98 {offsets = [8, 0], sizes = [8, 32], strides = [1, 1]} : vector<16x32xf32> to vector<8x32xf32>
    %c8_84 = arith.constant 8 : index
    %c0_85 = arith.constant 0 : index
    %c0_86 = arith.constant 0 : index
    %139 = vector.load %arg7[%c8_84, %c0_85, %c0_86] : memref<9x32x32xf32, #tpu.memory_space<vmem>>, vector<1x32x32xf32>
    %140 = vector.shape_cast %139 : vector<1x32x32xf32> to vector<32x32xf32>
    %cst_87 = arith.constant dense<0.000000e+00> : vector<8x32xf32>
    %141 = tpu.matmul %138, %140, %cst_87 {dimension_numbers = #tpu.dot_dimension_numbers<[1], [0], [0], [1], [0, 0, 1, 1], [], []>} : vector<8x32xf32>, vector<32x32xf32>, vector<8x32xf32> -> vector<8x32xf32>
    %142 = arith.addf %137, %141 : vector<8x32xf32>
    %c0_88 = arith.constant 0 : index
    %c0_89 = arith.constant 0 : index
    %143 = vector.load %arg8[%c0_88, %c0_89] : memref<3x32xf32, #tpu.memory_space<vmem>>, vector<1x32xf32>
    %144 = vector.broadcast %143 : vector<1x32xf32> to vector<8x32xf32>
    %145 = arith.addf %142, %144 : vector<8x32xf32>
    %cst_90 = arith.constant 5.000000e-01 : f32
    %146 = vector.broadcast %cst_90 : f32 to vector<8x32xf32>
    %147 = arith.mulf %146, %145 : vector<8x32xf32>
    %cst_91 = arith.constant 0.707106769 : f32
    %148 = vector.broadcast %cst_91 : f32 to vector<8x32xf32>
    %149 = arith.mulf %145, %148 : vector<8x32xf32>
    %150 = math.erf %149 : vector<8x32xf32>
    %cst_92 = arith.constant 1.000000e+00 : f32
    %151 = vector.broadcast %cst_92 : f32 to vector<8x32xf32>
    %152 = arith.addf %151, %150 : vector<8x32xf32>
    %153 = arith.mulf %147, %152 : vector<8x32xf32>
    %c1_93 = arith.constant 1 : index
    %c0_94 = arith.constant 0 : index
    %154 = vector.load %arg8[%c1_93, %c0_94] : memref<3x32xf32, #tpu.memory_space<vmem>>, vector<1x32xf32>
    %155 = vector.broadcast %154 : vector<1x32xf32> to vector<8x32xf32>
    %156 = arith.mulf %153, %155 : vector<8x32xf32>
    %c2_95 = arith.constant 2 : index
    %c0_96 = arith.constant 0 : index
    %157 = vector.load %arg8[%c2_95, %c0_96] : memref<3x32xf32, #tpu.memory_space<vmem>>, vector<1x32xf32>
    %158 = vector.broadcast %157 : vector<1x32xf32> to vector<8x32xf32>
    %159 = arith.addf %156, %158 : vector<8x32xf32>
    %c0_97 = arith.constant 0 : index
    %c0_98 = arith.constant 0 : index
    %c0_99 = arith.constant 0 : index
    %160 = vector.load %arg9[%c0_97, %c0_98, %c0_99] : memref<1x8x32xf32, #tpu.memory_space<vmem>>, vector<1x8x32xf32>
    %161 = vector.shape_cast %160 : vector<1x8x32xf32> to vector<8x32xf32>
    %162 = vector.shape_cast %159 : vector<8x32xf32> to vector<1x8x32xf32>
    tpu.vector_store %arg9[%c0_97, %c0_98, %c0_99], %162 {strides = array<i32>} : memref<1x8x32xf32, #tpu.memory_space<vmem>>, vector<1x8x32xf32>,
    return
  }
  func.func @transform_0(%arg0: i32, %arg1: i32) -> (i32, i32, i32, i32) {
    %c0_i32 = arith.constant 0 : i32
    %c0_i32_0 = arith.constant 0 : i32
    %c0_i32_1 = arith.constant 0 : i32
    return %arg0, %arg1, %c0_i32, %c0_i32_0 : i32, i32, i32, i32
  }
  func.func @transform_1(%arg0: i32, %arg1: i32) -> (i32, i32) {
    %c0_i32 = arith.constant 0 : i32
    %c0_i32_0 = arith.constant 0 : i32
    %c0_i32_1 = arith.constant 0 : i32
    return %c0_i32, %c0_i32_0 : i32, i32
  }
  func.func @transform_2(%arg0: i32, %arg1: i32) -> (i32, i32) {
    %c0_i32 = arith.constant 0 : i32
    %c0_i32_0 = arith.constant 0 : i32
    %c0_i32_1 = arith.constant 0 : i32
    return %c0_i32, %c0_i32_0 : i32, i32
  }
  func.func @transform_3(%arg0: i32, %arg1: i32) -> (i32, i32, i32) {
    %c0_i32 = arith.constant 0 : i32
    %c0_i32_0 = arith.constant 0 : i32
    %c0_i32_1 = arith.constant 0 : i32
    %c0_i32_2 = arith.constant 0 : i32
    return %c0_i32, %c0_i32_0, %c0_i32_1 : i32, i32, i32
  }
  func.func @transform_4(%arg0: i32, %arg1: i32) -> (i32, i32) {
    %c0_i32 = arith.constant 0 : i32
    %c0_i32_0 = arith.constant 0 : i32
    %c0_i32_1 = arith.constant 0 : i32
    return %c0_i32, %c0_i32_0 : i32, i32
  }
  func.func @transform_5(%arg0: i32, %arg1: i32) -> (i32, i32, i32) {
    %c0_i32 = arith.constant 0 : i32
    %c0_i32_0 = arith.constant 0 : i32
    %c0_i32_1 = arith.constant 0 : i32
    %c0_i32_2 = arith.constant 0 : i32
    return %c0_i32, %c0_i32_0, %c0_i32_1 : i32, i32, i32
  }
  func.func @transform_6(%arg0: i32, %arg1: i32) -> (i32, i32) {
    %c0_i32 = arith.constant 0 : i32
    %c0_i32_0 = arith.constant 0 : i32
    %c0_i32_1 = arith.constant 0 : i32
    return %c0_i32, %c0_i32_0 : i32, i32
  }
  func.func @transform_7(%arg0: i32, %arg1: i32) -> (i32, i32, i32) {
    %c0_i32 = arith.constant 0 : i32
    %c0_i32_0 = arith.constant 0 : i32
    return %arg0, %arg1, %c0_i32 : i32, i32, i32
  }
}

</mosaic_0001>

<bundles_post_ra>
// kernel: ecog_frontend.1
= control target key start
LH: loop header
LB: loop body
LE: loop exit
PB: predicated region body
PF: predicated region fallthrough
CT: control target
= control target key end

     0   :  { %s3557_s0 = inlined_call_operand.vmem [shape: f32[2,2,24,36], index: 0, kind: input, shape index: {}]   ;;  %s3558_s1 = inlined_call_operand.vmem [shape: f32[36,32], index: 1, kind: input, shape index: {}]   ;;  %s3559_s2 = inlined_call_operand.vmem [shape: f32[3,32], index: 2, kind: input, shape index: {}]   ;;  %s3560_s3 = inlined_call_operand.vmem [shape: f32[9,32,32], index: 3, kind: input, shape index: {}]   ;;  %s3561_s4 = inlined_call_operand.vmem [shape: f32[3,32], index: 4, kind: input, shape index: {}]   ;;  %s3562_s5 = inlined_call_operand.vmem [shape: f32[9,32,32], index: 5, kind: input, shape index: {}]   ;;  %s3563_s6 = inlined_call_operand.vmem [shape: f32[3,32], index: 6, kind: input, shape index: {}]   ;;  %s3564_s7 = inlined_call_operand.hbm [shape: f32[2,16,32], index: 7, kind: output, shape index: {}]  }
   0x1   :  { %3566 = sst [smem:[#allocation6_spill]] %s3557_s0 }
   0x2   :  { %3567 = sst [smem:[#allocation7_spill]] %s3558_s1 }
   0x3   :  { %12 = vsyncpa [#allocation3], 0 }
   0x4   :  { %14 = vsyncpa [#allocation3 + $0x1], 0  ;;  %s2990_s24 = smov 0   ;;  %s2992_s25 = smov 0  }
   0x5   :  { %s2994_s26 = smov 0   ;;  %s2996_s27 = smov 0  }
   0x6   :  { %s2998_s28 = smov 0   ;;  %s3000_s29 = smov 0  }
   0x7   :  { %s3002_s30 = smov 0   ;;  %s3004_s8 = smov 0  }
   0x8 LB: > { %s2169_s9 = sadd.s32 4294967295, %s2944_s8   ;;  %s2170_s10 = sadd.s32 4294967294, %s2944_s8   ;;  %s2944_s8 = sphi %s3004_s8, %s20_s8   ;;  %s2940_s30 = sphi %s3002_s30, %s3580_s30   ;;  %s2936_s29 = sphi %s3000_s29, %s3579_s29   ;;  %s2932_s28 = sphi %s2998_s28, %s3578_s28   ;;  %s2928_s27 = sphi %s2996_s27, %s3577_s27   ;;  %s2924_s26 = sphi %s2994_s26, %s3576_s26   ;;  %s2920_s25 = sphi %s2992_s25, %s3575_s25   ;;  %s2916_s24 = sphi %s2990_s24, %s3574_s24  }
   0x9   : > { %s29_s11 = sadd.s32 1, %s2936_s29  ;;  %s32_s12 = sadd.s32 1, %s2940_s30 }
   0xa   : > { %p30_p0 = scmp.ge.s32.totalorder %s29_s11, 2  ;;  %p205_p1 = scmp.ne.s32.totalorder %s2924_s26, %s2920_s25 }
   0xb   : > { %p206_p2 = scmp.eq.s32.totalorder %s2169_s9, 3  ;;  %p211_p5 = scmp.ne.s32.totalorder %s2920_s25, %s2916_s24 }
   0xc   : > { %s3582_s11 = smov (%p30_p0, %s29_s11), 0  ;;  %s3584_s12 = smov (!%p30_p0, %s32_s12), %s2940_s30 }
   0xd   : > { %s191_s13 = ssub.s32 %s2936_s29, %s3582_s11  ;;  %p3041_p3 = por %p206_p2, %p205_p1 }
   0xe   : > { %p34_p4 = scmp.ge.s32.totalorder %s3584_s12, 2  ;;  %p212_p6 = scmp.eq.s32.totalorder %s2170_s10, 3 }
   0xf   : > { %p2173_p7 = scmp.ge.s32.totalorder %s2944_s8, 1  ;;  %p260_p9 = scmp.lt.s32.totalorder %s2944_s8, 5 }
  0x10   : > { %s3586_s12 = smov (%p34_p4, %s3584_s12), 0  ;;  %p3050_p8 = por %p212_p6, %p211_p5 }
  0x11   : > { %3569 = sst [smem:[#allocation5_spill]] %s3586_s12  ;;  %s190_s16 = ssub.s32 %s2940_s30, %s3586_s12 }
  0x12   : > { %s195_s17 = sadd.s32 1, %s2924_s26  ;;  %s192_s18 = sor.u32 %s191_s13, %s190_s16 }
  0x13   : > { %p261_p10 = pnand %p2173_p7, %p260_p9  ;;  %p193_p11 = scmp.eq.s32.totalorder %s192_s18, 0 }
  0x14   : > { %s3571_s1 = sld [smem:[#allocation7_spill]] (!%p261_p10)  ;;  %v2946_v3 = vmov (!%p261_p10), 0.0|0.0   ;;  %p296_p12 = scmp.lt.s32.totalorder (!%p261_p10), %s2932_s28, 1  ;;  %vm2947_vm0 = vmmov (!%p261_p10), 0   ;;  %v2948_v6 = vmov (!%p261_p10), 0.0   ;;  %vm353_vm1 = vcmask (!%p261_p10), 1043456  }
  0x15   : > { %s3059_s19 = scalar_select %p193_p11, %s2924_s26, %s195_s17  }
  0x16   : > { %264 = sbr.rel (%p261_p10) target bundleno = 900 (0x384), region = 48  ;;  %2614 = vmatprep.subr.bf16.mxu0 (!%p261_p10), %v2946_v3  ;;  %p298_p13 = scmp.lt.s32.totalorder (!%p261_p10), %s2928_s27, 1  ;;  %2407 = vmatprep.mubr.msk.f32.mxu0 (!%p261_p10), %vm2947_vm0, %v2948_v6  ;;  %vm343_vm2 = vcmask (!%p261_p10), 293888   ;;  %v2188_v12 = vld [vmem:[%s3560_s3 + $0x20] sm:$0xff] (!%p261_p10)  ;;  %v2189_v13 = vld [vmem:[%s3560_s3 + $0x28] sm:$0xff] (!%p261_p10)  ;;  %v2190_v15 = vld [vmem:[%s3560_s3 + $0x30] sm:$0xff] (!%p261_p10)  ;;  %v307_v25 = vlaneseq (!%p261_p10) }
  0x17   : > { %s3572_s0 = sld [smem:[#allocation6_spill]] (!%p261_p10)  ;;  %v2620_v14 = vpack.c.bf16 (!%p261_p10), %v2189_v13, %v2188_v12  ;;  %v2191_v16 = vld [vmem:[%s3560_s3 + $0x38] sm:$0xff] (!%p261_p10)  ;;  %v471_v18 = vld [vmem:[%s3560_s3] sm:$0xff] (!%p261_p10)  ;;  %v472_v19 = vld [vmem:[%s3560_s3 + $0x8] sm:$0xff] (!%p261_p10)  ;;  %vm483_vm12 = vcmask (!%p261_p10), 1046528   ;;  %vm653_vm13 = vcmask (!%p261_p10), 1045504  }
  0x18   : > { %v2624_v17 = vpack.c.bf16 (!%p261_p10), %v2191_v16, %v2190_v15  ;;  %v3114_v20 = vpack.c.bf16 (!%p261_p10), %v472_v19, %v471_v18  ;;  %v2181_v21 = vld [vmem:[%s3559_s2] ss:$0 sm:$0xff] (!%p261_p10)  ;;  %v308_v30 = vshrl.u32 (!%p261_p10), %v307_v25, 7  ;;  %v2186_v45 = vld [vmem:[%s3559_s2 + $0x1] ss:$0 sm:$0xff] (!%p261_p10)  ;;  %vm489_vm14 = vcmask (!%p261_p10), 261120  }
  0x19   : > { %2621 = vmatprep.subr.bf16.mxu1 (!%p261_p10), %v2620_v14  ;;  %v2187_v48 = vld [vmem:[%s3559_s2 + $0x2] ss:$0 sm:$0xff] (!%p261_p10)  ;;  %vm745_vm15 = vcmask (!%p261_p10), 1044480  }
  0x1a   : > { %v333_v0 = vld [vmem:[%s3571_s1] sm:$0xff] (!%p261_p10)  ;;  %v334_v1 = vld [vmem:[%s3571_s1 + $0x8] sm:$0xff] (!%p261_p10)  ;;  %v335_v2 = vld [vmem:[%s3571_s1 + $0x10] sm:$0xff] (!%p261_p10)  ;;  %2623 = vmatpush3.bf16.msra.mxu1 (!%p261_p10), %v2620_v14  ;;  %v309_v36 = vadd.s32 (!%p261_p10), 8, %v308_v30  ;;  %v310_v38 = vadd.s32 (!%p261_p10), 16, %v308_v30 }
  0x1b   : > { %v2615_v4 = vpack.c.bf16 (!%p261_p10), %v334_v1, %v333_v0  ;;  %v336_v5 = vld [vmem:[%s3571_s1 + $0x18] sm:$0xff] (!%p261_p10)  ;;  %v337_v8 = vld [vmem:[%s3571_s1 + $0x20] sm:$0xf] (!%p261_p10)  ;;  %2625 = vmatprep.subr.bf16.mxu1 (!%p261_p10), %v2624_v17 }
  0x1c   : > { %v2618_v7 = vpack.c.bf16 (!%p261_p10), %v336_v5, %v335_v2 }
  0x1d   : > { %2616 = vmatpush3.bf16.msra.mxu0 %v2615_v4  ;;  %s297_s17 = scalar_select %p296_p12, %s2932_s28, 1 }
  0x1e   : > { %2617 = vmatprep.subr.bf16.mxu0 %v2946_v3  ;;  %s299_s18 = scalar_select %p298_p13, %s2928_s27, 1  ;;  %2627 = vmatpush3.bf16.msra.mxu1 %v2624_v17 }
  0x1f   : > { %s2763_s20 = smul.u32 6, %s297_s17  ;;  %2629 = vmatprep.subr.bf16.mxu1 %v3114_v20 }
  0x20   : > { %s2762_s21 = smul.u32 3, %s299_s18 }
  0x21   : > { %2619 = vmatpush3.bf16.msra.mxu0 %v2618_v7 }
  0x22   : > { %2405 = vmatprep.subr.mxu0 %v2948_v6  ;;  %s302_s9 = sadd.s32 %s2763_s20, %s2762_s21  ;;  %s2176_s21 = sshll.u32 %s2928_s27, 3 }
  0x23   : > { %s2175_s10 = sshll.u32 %s302_s9, 3  ;;  %s2177_s22 = sadd.s32 4294967288, %s2176_s21 }
  0x24   : > { %s304_s12 = scalar_lea.vmem %s3572_s0, %s2175_s10  ;;  %v311_v32 = vstv %s2177_s22  ;;  %s2286_s10 = sshll.u32 %s2932_s28, 1 }
  0x25   : > { %2406 = vmatpush3.msk.msra.mxu0 %vm353_vm1, %v337_v8  ;;  %v330_v9 = vld [vmem:[%s304_s12] sm:$0xff]  ;;  %v331_v10 = vld [vmem:[%s304_s12 + $0x8] sm:$0xff]  ;;  %v332_v11 = vld [vmem:[%s304_s12 + $0x10] sm:$0xff]  ;;  %v312_v37 = vadd.s32 %v311_v32, %v308_v30  ;;  %v313_v40 = vadd.s32 %v311_v32, %v309_v36  ;;  %v314_v42 = vadd.s32 %v311_v32, %v310_v38  ;;  %s293_s12 = sand.u32 1, %s2920_s25   ;;  %s2084_s13 = sadd.s32 %s2928_s27, %s2286_s10 }
  0x26   : > { %2408 = vmatmul.mubr.msk.f32.vlgmr.msra.gmra.mrb[0].mxu0 %vm343_vm2, %v330_v9  ;;  %2692 = vmatprep.subr.bf16.mxu0 %v2946_v3  ;;  %v2198_v36 = vld [vmem:[%s3560_s3 + $0x50] sm:$0xff]  ;;  %s2174_s9 = sshll.u32 %s293_s12, 3  ;;  %s2287_s21 = sshll.u32 %s2084_s13, 7 }
  0x27   : > { %2410 = vmatprep.mubr.msk.f32.mxu0 %vm2947_vm0, %v2948_v6  ;;  %vm315_vm3 = vcmp.ge.s32.totalorder %v312_v37, 0  ;;  %vm318_vm4 = vcmp.lt.s32.totalorder %v312_v37, 16  ;;  %vm316_vm6 = vcmp.ge.s32.totalorder %v313_v40, 0  ;;  %vm319_vm7 = vcmp.lt.s32.totalorder %v313_v40, 16  ;;  %v2199_v37 = vld [vmem:[%s3560_s3 + $0x58] sm:$0xff]  ;;  %s295_s22 = scalar_lea.vmem [#allocation2], %s2174_s9  ;;  %s3503_s1 = scalar_lea.hbm %s3564_s7, %s2287_s21 }
  0x28   : > { %vm321_vm5 = vmand %vm315_vm3, %vm318_vm4  ;;  %vm317_vm8 = vcmp.ge.s32.totalorder %v314_v42, 0  ;;  %vm320_vm9 = vcmp.lt.s32.totalorder %v314_v42, 16  ;;  %vm1020_vm3 = vcmask 1041408   ;;  %vm1112_vm4 = vcmask 1040384   ;;  %v2204_v42 = vld [vmem:[%s3560_s3 + $0x70] sm:$0xff]  ;;  %s2088_s23 = sshll.u32 %s295_s22, 4  ;;  %s3505_s23 = int_to_ptr.vmem [resolvable:$true] %s2088_s23 }
  0x29   : > { %v3128_v52 = vsel %vm321_vm5, 1.0, %v2948_v6  ;;  %vm322_vm10 = vmand %vm316_vm6, %vm319_vm7  ;;  %v2640_v38 = vpack.c.bf16 %v2199_v37, %v2198_v36  ;;  %v2243_v37 = vld [vmem:[%s3562_s5 + $0x30] sm:$0xff]  ;;  %s2073_s27 = scalar_lea.sflag [#allocation3], %s293_s12  ;;  %s2850_s10 = scalar_lea.vmem %s3505_s23, 128 }
  0x2a   : > { %2411 = vmatmul.mubr.msk.f32.gmra.mrb[2].mxu0 %vm343_vm2, %v331_v10  ;;  %vm323_vm11 = vmand %vm317_vm8, %vm320_vm9  ;;  %v3132_v60 = vsel %vm322_vm10, 1.0, %v2948_v6  ;;  %p2851_p0 = scmp.ne.s32.totalorder %s3505_s23, %s2850_s10  ;;  %s2949_s9 = smov [#allocation2]  }
  0x2b   : > { %2413 = vmatprep.mubr.msk.f32.mxu0 %vm2947_vm0, %v2948_v6  ;;  %v3135_v61 = vsel %vm323_vm11, 1.0, %v2948_v6  ;;  %s2854_s13 = sshll.u32 %s2949_s9, 4  ;;  %s2855_s13 = int_to_ptr.vmem [resolvable:$false] %s2854_s13 }
  0x2c   : > { %p2852_p1 = pnand %p2851_p0, %p3041_p3  ;;  %s2856_s16 = scalar_lea.vmem %s2855_s13, 256 }
  0x2d   : > { %p2857_p4 = scmp.lt.s32.totalorder %s3505_s23, %s2855_s13  ;;  %p2858_p5 = scmp.lt.s32.totalorder %s2856_s16, %s2850_s10 }
  0x2e   : > { %2414 = vmatmul.mubr.msk.f32.gmra.mrb[4].mxu0 %vm343_vm2, %v332_v11  ;;  %vm928_vm2 = vcmask 1042432   ;;  %p2853_p2 = pneg %p2852_p1 }
  0x2f   : > { %2523 = vmatprep.mubr.msk.f32.mxu0 %vm2947_vm0, %v2948_v6  ;;  %p2859_p6 = por %p2858_p5, %p2857_p4 }
  0x31   : > { %p2860_p7 = pnand %p2859_p6, %p2853_p2 }
  0xf9   : > { %v423_v22 = vpop.f32.mrb[0].mxu0 }
  0xfa   : > { %v424_v23 = vadd.f32 %v2181_v21, %v423_v22  ;;  %v2409_v24 = vpop.f32.mrb[1].mxu0  ;;  %v473_v22 = vld [vmem:[%s3560_s3 + $0x10] sm:$0xff] }
  0xfc   : > { %v440_v26 = vmul.f32 0.70710677, %v424_v23  ;;  %v437_v43 = vmul.f32 0.5, %v424_v23  ;;  %v474_v23 = vld [vmem:[%s3560_s3 + $0x18] sm:$0xff] }
  0xfd   : > { %v428_v27 = vpop.f32.mrb[2].mxu0 }
  0xfe   : > { %2838 = verf.f32 %v440_v26  ;;  %v429_v28 = vadd.f32 %v2181_v21, %v428_v27  ;;  %v2412_v29 = vpop.f32.mrb[3].mxu0 }
 0x100   : > { %v441_v31 = vmul.f32 0.70710677, %v429_v28  ;;  %v438_v50 = vmul.f32 0.5, %v429_v28 }
 0x101   : > { %v433_v33 = vpop.f32.mrb[4].mxu0 }
 0x102   : > { %2840 = verf.f32 %v441_v31  ;;  %v434_v34 = vadd.f32 %v2181_v21, %v433_v33  ;;  %v2415_v35 = vpop.f32.mrb[5].mxu0  ;;  %v2632_v31 = vpack.c.bf16 %v474_v23, %v473_v22  ;;  %v2196_v33 = vld [vmem:[%s3560_s3 + $0x40] sm:$0xff] }
 0x104   : > { %v442_v39 = vmul.f32 0.70710677, %v434_v34  ;;  %v439_v58 = vmul.f32 0.5, %v434_v34  ;;  %v2197_v34 = vld [vmem:[%s3560_s3 + $0x48] sm:$0xff] }
 0x105   : > { %v2636_v35 = vpack.c.bf16 %v2197_v34, %v2196_v33  ;;  %v2279_v34 = vld [vmem:[%s3562_s5 + $0x110] sm:$0xff] }
 0x106   : > { %2842 = verf.f32 %v442_v39  ;;  %v2202_v39 = vld [vmem:[%s3560_s3 + $0x60] sm:$0xff] }
 0x108   : > { %v2839_v41 = vpop.eup %2838 }
 0x109   : > { %v446_v44 = vadd.f32 1.0, %v2839_v41 }
 0x10b   : > { %v449_v46 = vmul.f32 %v446_v44, %v437_v43  ;;  %v2205_v43 = vld [vmem:[%s3560_s3 + $0x78] sm:$0xff] }
 0x10c   : > { %v2841_v47 = vpop.eup %2840  ;;  %v2648_v44 = vpack.c.bf16 %v2205_v43, %v2204_v42 }
 0x10d   : > { %v457_v49 = vmul.f32 %v2186_v45, %v449_v46  ;;  %v447_v51 = vadd.f32 1.0, %v2841_v47  ;;  %v2208_v46 = vld [vmem:[%s3560_s3 + $0x80] sm:$0xff]  ;;  %v2209_v47 = vld [vmem:[%s3560_s3 + $0x88] sm:$0xff] }
 0x10f   : > { %v465_v53 = vadd.f32 %v2187_v48, %v457_v49  ;;  %v450_v54 = vmul.f32 %v447_v51, %v438_v50  ;;  %v2210_v50 = vld [vmem:[%s3560_s3 + $0x90] sm:$0xff]  ;;  %v2211_v51 = vld [vmem:[%s3560_s3 + $0x98] sm:$0xff] }
 0x110   : > { %v2843_v55 = vpop.eup %2842 }
 0x111   : > { %v468_v56 = vmul.f32 %v3128_v52, %v465_v53  ;;  %v458_v57 = vmul.f32 %v2186_v45, %v450_v54  ;;  %v448_v59 = vadd.f32 1.0, %v2843_v55  ;;  %v2656_v53 = vpack.c.bf16 %v2211_v51, %v2210_v50  ;;  %v2214_v55 = vld [vmem:[%s3560_s3 + $0xa0] sm:$0xff] }
 0x112   : > { %v1318_v50 = vrot.slane %v3132_v60, 4  ;;  %v1320_v51 = vrot.slane %v3135_v61, 4 }
 0x113   : > { %v466_v62 = vadd.f32 %v2187_v48, %v458_v57  ;;  %v451_v63 = vmul.f32 %v448_v59, %v439_v58  ;;  %v484_v0 = vrot.slane %v468_v56, 1  ;;  %v654_v4 = vrot.slane %v468_v56, 2  ;;  %v2216_v59 = vld [vmem:[%s3560_s3 + $0xb0] sm:$0xff] }
 0x114   : > { %v746_v5 = vrot.slane %v468_v56, 3  ;;  %v837_v7 = vrot.slane %v468_v56, 4  ;;  %v929_v8 = vrot.slane %v468_v56, 5  ;;  %v1021_v9 = vrot.slane %v468_v56, 6 }
 0x115   : > { %v3138_v1 = vmul.f32 %v3132_v60, %v466_v62  ;;  %v459_v2 = vmul.f32 %v2186_v45, %v451_v63  ;;  %v1113_v10 = vrot.slane %v468_v56, 7  ;;  %v2217_v62 = vld [vmem:[%s3560_s3 + $0xb8] sm:$0xff] }
 0x116   : > { %v2664_v63 = vpack.c.bf16 %v2217_v62, %v2216_v59 }
 0x117   : > { %v467_v11 = vadd.f32 %v2187_v48, %v459_v2  ;;  %v485_v12 = vrot.slane %v3138_v1, 1  ;;  %v655_v13 = vrot.slane %v3138_v1, 2  ;;  %v747_v14 = vrot.slane %v3138_v1, 3  ;;  %v2220_v2 = vld [vmem:[%s3560_s3 + $0xc0] sm:$0xff] }
 0x118   : > { %v838_v15 = vrot.slane %v3138_v1, 4  ;;  %v930_v16 = vrot.slane %v3138_v1, 5  ;;  %v1022_v17 = vrot.slane %v3138_v1, 6  ;;  %v1114_v18 = vrot.slane %v3138_v1, 7 }
 0x119   : > { %v3148_v19 = vmul.f32 %v3135_v61, %v467_v11  ;;  %v486_v21 = vsel %vm483_vm12, %v484_v0, %v485_v12  ;;  %v656_v24 = vsel %vm653_vm13, %v654_v4, %v655_v13  ;;  %v748_v25 = vsel %vm745_vm15, %v746_v5, %v747_v14  ;;  %v2221_v4 = vld [vmem:[%s3560_s3 + $0xc8] sm:$0xff] }
 0x11a   : > { %2424 = vmatprep.mubr.msk.f32.mxu1 %vm489_vm14, %v486_v21  ;;  %v839_v26 = vsel %vm353_vm1, %v837_v7, %v838_v15  ;;  %v3166_v27 = vsel %vm928_vm2, %v929_v8, %v930_v16  ;;  %v3171_v28 = vsel %vm1020_vm3, %v1021_v9, %v1022_v17  ;;  %v3176_v29 = vsel %vm1112_vm4, %v1113_v10, %v1114_v18  ;;  %v2222_v8 = vld [vmem:[%s3560_s3 + $0xd0] sm:$0xff]  ;;  %v2223_v9 = vld [vmem:[%s3560_s3 + $0xd8] sm:$0xff] }
 0x11b   : > { %v487_v30 = vrot.slane %v3148_v19, 1  ;;  %v657_v41 = vrot.slane %v3148_v19, 2  ;;  %v2652_v48 = vpack.c.bf16 %v2209_v47, %v2208_v46  ;;  %v749_v49 = vrot.slane %v3148_v19, 3  ;;  %v2229_v21 = vld [vmem:[%s3560_s3 + $0xf8] sm:$0xff] }
 0x11c   : > { %v840_v58 = vrot.slane %v3148_v19, 4  ;;  %v2668_v5 = vpack.c.bf16 %v2221_v4, %v2220_v2  ;;  %v932_v7 = vrot.slane %v3148_v19, 5  ;;  %v2672_v10 = vpack.c.bf16 %v2223_v9, %v2222_v8  ;;  %v1326_v2 = vld [vmem:[%s3562_s5] sm:$0xff] }
 0x11d   : > { %v488_v32 = vsel %vm483_vm12, %v485_v12, %v487_v30  ;;  %v658_v45 = vsel %vm653_vm13, %v655_v13, %v657_v41  ;;  %v750_v54 = vsel %vm745_vm15, %v747_v14, %v749_v49  ;;  %v2226_v12 = vld [vmem:[%s3560_s3 + $0xe0] sm:$0xff]  ;;  %v2227_v13 = vld [vmem:[%s3560_s3 + $0xe8] sm:$0xff] }
 0x11e   : > { %2425 = vmatmul.mubr.msk.f32.vlgmr.msra.gmra.mrb[0].mxu1 %vm489_vm14, %v488_v32  ;;  %v841_v0 = vsel %vm353_vm1, %v838_v15, %v840_v58  ;;  %v933_v11 = vsel %vm928_vm2, %v930_v16, %v932_v7  ;;  %v2676_v14 = vpack.c.bf16 %v2227_v13, %v2226_v12  ;;  %v1024_v15 = vrot.slane %v3148_v19, 6  ;;  %v2228_v16 = vld [vmem:[%s3560_s3 + $0xf0] sm:$0xff]  ;;  %v2240_v58 = vld [vmem:[%s3561_s4 + $0x2] ss:$0 sm:$0xff] }
 0x11f   : > { %2631 = vmatpush3.bf16.msra.mxu1 %v3114_v20  ;;  %2435 = vmatprep.mubr.msk.f32.mxu1 %vm489_vm14, %v468_v56  ;;  %v2203_v20 = vld [vmem:[%s3560_s3 + $0x68] sm:$0xff]  ;;  %v2680_v22 = vpack.c.bf16 %v2229_v21, %v2228_v16  ;;  %v1328_v21 = vld [vmem:[%s3562_s5 + $0x10] sm:$0xff] }
 0x120   : > { %2633 = vmatprep.subr.bf16.mxu1 %v2632_v31  ;;  %v2644_v40 = vpack.c.bf16 %v2203_v20, %v2202_v39  ;;  %v2215_v56 = vld [vmem:[%s3560_s3 + $0xa8] sm:$0xff]  ;;  %v1025_v23 = vsel %vm1020_vm3, %v1022_v17, %v1024_v15  ;;  %v2234_v17 = vld [vmem:[%s3560_s3 + $0x110] sm:$0xff]  ;;  %v2238_v20 = vld [vmem:[%s3561_s4] ss:$0 sm:$0xff] }
 0x121   : > { %v2660_v57 = vpack.c.bf16 %v2215_v56, %v2214_v55  ;;  %v1317_v56 = vrot.slane %v3128_v52, 4  ;;  %v1327_v52 = vld [vmem:[%s3562_s5 + $0x8] sm:$0xff] }
 0x122   : > { %v2699_v8 = vpack.c.bf16 %v1327_v52, %v1326_v2  ;;  %v2274_v52 = vld [vmem:[%s3562_s5 + $0xf0] sm:$0xff] }
 0x123   : > { %2635 = vmatpush3.bf16.msra.mxu1 %v2632_v31  ;;  %v1319_v61 = vsel %vm353_vm1, %v1317_v56, %v1318_v50 }
 0x124   : > { %2637 = vmatprep.subr.bf16.mxu1 %v2636_v35 }
 0x126   : > { %2436 = vmatmul.mubr.msk.f32.vlgmr.msra.gmra.mrb[0].mxu1 %vm489_vm14, %v3138_v1 }
 0x127   : > { %2639 = vmatpush3.bf16.msra.mxu1 %v2636_v35  ;;  %2446 = vmatprep.mubr.msk.f32.mxu1 %vm489_vm14, %v656_v24  ;;  %v2232_v24 = vld [vmem:[%s3560_s3 + $0x100] sm:$0xff]  ;;  %v2280_v35 = vld [vmem:[%s3562_s5 + $0x118] sm:$0xff] }
 0x128   : > { %2641 = vmatprep.subr.bf16.mxu1 %v2640_v38  ;;  %v2744_v36 = vpack.c.bf16 %v2280_v35, %v2279_v34 }
 0x12b   : > { %2643 = vmatpush3.bf16.msra.mxu1 %v2640_v38  ;;  %v2244_v38 = vld [vmem:[%s3562_s5 + $0x38] sm:$0xff] }
 0x12c   : > { %2645 = vmatprep.subr.bf16.mxu1 %v2644_v40  ;;  %v2696_v39 = vpack.c.bf16 %v2244_v38, %v2243_v37  ;;  %v2250_v37 = vld [vmem:[%s3562_s5 + $0x58] sm:$0xff] }
 0x12e   : > { %2447 = vmatmul.mubr.msk.f32.vlgmr.msra.gmra.mrb[0].mxu1 %vm489_vm14, %v658_v45 }
 0x12f   : > { %2647 = vmatpush3.bf16.msra.mxu1 %v2644_v40  ;;  %2457 = vmatprep.mubr.msk.f32.mxu1 %vm489_vm14, %v748_v25  ;;  %v2233_v25 = vld [vmem:[%s3560_s3 + $0x108] sm:$0xff] }
 0x130   : > { %2649 = vmatprep.subr.bf16.mxu1 %v2648_v44 }
 0x133   : > { %2651 = vmatpush3.bf16.msra.mxu1 %v2648_v44 }
 0x134   : > { %2653 = vmatprep.subr.bf16.mxu1 %v2652_v48 }
 0x136   : > { %2458 = vmatmul.mubr.msk.f32.vlgmr.msra.gmra.mrb[0].mxu1 %vm489_vm14, %v750_v54 }
 0x137   : > { %2655 = vmatpush3.bf16.msra.mxu1 %v2652_v48  ;;  %2468 = vmatprep.mubr.msk.f32.mxu1 %vm489_vm14, %v839_v26  ;;  %v2684_v26 = vpack.c.bf16 %v2233_v25, %v2232_v24 }
 0x138   : > { %2657 = vmatprep.subr.bf16.mxu1 %v2656_v53 }
 0x13b   : > { %2659 = vmatpush3.bf16.msra.mxu1 %v2656_v53  ;;  %v2239_v53 = vld [vmem:[%s3561_s4 + $0x1] ss:$0 sm:$0xff] }
 0x13c   : > { %2661 = vmatprep.subr.bf16.mxu1 %v2660_v57 }
 0x13e   : > { %2469 = vmatmul.mubr.msk.f32.vlgmr.msra.gmra.mrb[0].mxu1 %vm489_vm14, %v841_v0 }
 0x13f   : > { %2663 = vmatpush3.bf16.msra.mxu1 %v2660_v57  ;;  %2479 = vmatprep.mubr.msk.f32.mxu1 %vm489_vm14, %v3166_v27  ;;  %v1116_v27 = vrot.slane %v3148_v19, 7 }
 0x140   : > { %2665 = vmatprep.subr.bf16.mxu1 %v2664_v63 }
 0x141   : > { %v1117_v31 = vsel %vm1112_vm4, %v1114_v18, %v1116_v27  ;;  %v2277_v18 = vld [vmem:[%s3562_s5 + $0x100] sm:$0xff] }
 0x143   : > { %2667 = vmatpush3.bf16.msra.mxu1 %v2664_v63  ;;  %v1321_v63 = vsel %vm353_vm1, %v1318_v50, %v1320_v51  ;;  %v2262_v50 = vld [vmem:[%s3562_s5 + $0xa0] sm:$0xff]  ;;  %v2263_v51 = vld [vmem:[%s3562_s5 + $0xa8] sm:$0xff] }
 0x144   : > { %2669 = vmatprep.subr.bf16.mxu1 %v2668_v5 }
 0x146   : > { %2480 = vmatmul.mubr.msk.f32.vlgmr.msra.gmra.mrb[0].mxu1 %vm489_vm14, %v933_v11 }
 0x147   : > { %2671 = vmatpush3.bf16.msra.mxu1 %v2668_v5  ;;  %2490 = vmatprep.mubr.msk.f32.mxu1 %vm489_vm14, %v3171_v28  ;;  %v2235_v28 = vld [vmem:[%s3560_s3 + $0x118] sm:$0xff] }
 0x148   : > { %2673 = vmatprep.subr.bf16.mxu1 %v2672_v10  ;;  %v2688_v30 = vpack.c.bf16 %v2235_v28, %v2234_v17 }
 0x14b   : > { %2675 = vmatpush3.bf16.msra.mxu1 %v2672_v10 }
 0x14c   : > { %2677 = vmatprep.subr.bf16.mxu1 %v2676_v14 }
 0x14e   : > { %2491 = vmatmul.mubr.msk.f32.vlgmr.msra.gmra.mrb[0].mxu1 %vm489_vm14, %v1025_v23 }
 0x14f   : > { %2679 = vmatpush3.bf16.msra.mxu1 %v2676_v14  ;;  %2501 = vmatprep.mubr.msk.f32.mxu1 %vm489_vm14, %v3176_v29  ;;  %v2278_v29 = vld [vmem:[%s3562_s5 + $0x108] sm:$0xff] }
 0x150   : > { %2681 = vmatprep.subr.bf16.mxu1 %v2680_v22  ;;  %v2741_v32 = vpack.c.bf16 %v2278_v29, %v2277_v18 }
 0x153   : > { %2683 = vmatpush3.bf16.msra.mxu1 %v2680_v22  ;;  %v1329_v22 = vld [vmem:[%s3562_s5 + $0x18] sm:$0xff] }
 0x154   : > { %2685 = vmatprep.subr.bf16.mxu1 %v2684_v26 }
 0x156   : > { %2502 = vmatmul.mubr.msk.f32.vlgmr.msra.gmra.mrb[0].mxu1 %vm489_vm14, %v1117_v31 }
 0x157   : > { %2687 = vmatpush3.bf16.msra.mxu1 %v2684_v26  ;;  %2512 = vmatprep.mubr.msk.f32.mxu1 %vm489_vm14, %v3138_v1  ;;  %v2241_v1 = vld [vmem:[%s3562_s5 + $0x20] sm:$0xff] }
 0x158   : > { %2689 = vmatprep.subr.bf16.mxu1 %v2688_v30 }
 0x15b   : > { %2691 = vmatpush3.bf16.msra.mxu1 %v2688_v30 }
 0x15c   : > { %2740 = vmatprep.subr.bf16.mxu1 %v2946_v3 }
 0x15e   : > { %2513 = vmatmul.mubr.msk.f32.vlgmr.msra.gmra.mrb[0].mxu1 %vm489_vm14, %v3148_v19  ;;  %v2242_v19 = vld [vmem:[%s3562_s5 + $0x28] sm:$0xff] }
 0x15f   : > { %2611 = vmatprep.mubr.msk.f32.mxu1 %vm2947_vm0, %v2948_v6  ;;  %2742 = vmatpush3.bf16.msra.mxu1 %v2741_v32  ;;  %v2693_v33 = vpack.c.bf16 %v2242_v19, %v2241_v1  ;;  %v2702_v1 = vpack.c.bf16 %v1329_v22, %v1328_v21  ;;  %v2247_v19 = vld [vmem:[%s3562_s5 + $0x40] sm:$0xff] }
 0x160   : > { %2743 = vmatprep.subr.bf16.mxu1 %v2946_v3 }
 0x161   : > { %2694 = vmatpush3.bf16.msra.mxu0 %v2693_v33  ;;  %v2248_v33 = vld [vmem:[%s3562_s5 + $0x48] sm:$0xff] }
 0x162   : > { %2695 = vmatprep.subr.bf16.mxu0 %v2946_v3  ;;  %v2705_v35 = vpack.c.bf16 %v2248_v33, %v2247_v19 }
 0x163   : > { %2745 = vmatpush3.bf16.msra.mxu1 %v2744_v36  ;;  %v2249_v36 = vld [vmem:[%s3562_s5 + $0x50] sm:$0xff] }
 0x164   : > { %v2708_v38 = vpack.c.bf16 %v2250_v37, %v2249_v36  ;;  %v2283_v37 = vld [vmem:[%s3563_s6 + $0x1] ss:$0 sm:$0xff] }
 0x165   : > { %2697 = vmatpush3.bf16.msra.mxu0 %v2696_v39  ;;  %v2252_v39 = vld [vmem:[%s3562_s5 + $0x60] sm:$0xff] }
 0x166   : > { %2698 = vmatprep.subr.bf16.mxu0 %v2946_v3 }
 0x231   : > { %v2514_v40 = vpop.f32.mrb[0].mxu1 }
 0x232   : > { %v1289_v41 = vadd.f32 %v2514_v40, %v2238_v20  ;;  %v1272_v42 = vpop.f32.mrb[1].mxu1 }
 0x233   : > { %v1288_v43 = vadd.f32 %v2238_v20, %v1272_v42  ;;  %v2253_v20 = vld [vmem:[%s3562_s5 + $0x68] sm:$0xff]  ;;  %v2255_v42 = vld [vmem:[%s3562_s5 + $0x78] sm:$0xff] }
 0x234   : > { %v1293_v44 = vmul.f32 0.70710677, %v1289_v41  ;;  %v1291_v48 = vmul.f32 0.5, %v1289_v41  ;;  %v2711_v40 = vpack.c.bf16 %v2253_v20, %v2252_v39  ;;  %v2254_v41 = vld [vmem:[%s3562_s5 + $0x70] sm:$0xff]  ;;  %v2284_v39 = vld [vmem:[%s3563_s6 + $0x2] ss:$0 sm:$0xff] }
 0x235   : > { %v1292_v45 = vmul.f32 0.70710677, %v1288_v43  ;;  %v1290_v54 = vmul.f32 0.5, %v1288_v43  ;;  %v2714_v43 = vpack.c.bf16 %v2255_v42, %v2254_v41 }
 0x236   : > { %2844 = verf.f32 %v1293_v44  ;;  %v2257_v44 = vld [vmem:[%s3562_s5 + $0x80] sm:$0xff] }
 0x237   : > { %2846 = verf.f32 %v1292_v45  ;;  %v2258_v45 = vld [vmem:[%s3562_s5 + $0x88] sm:$0xff] }
 0x240   : > { %v2845_v46 = vpop.eup %2844 }
 0x241   : > { %v2847_v47 = vpop.eup %2846  ;;  %v1297_v49 = vadd.f32 1.0, %v2845_v46  ;;  %v2717_v46 = vpack.c.bf16 %v2258_v45, %v2257_v44 }
 0x242   : > { %v1296_v55 = vadd.f32 1.0, %v2847_v47  ;;  %v2259_v47 = vld [vmem:[%s3562_s5 + $0x90] sm:$0xff] }
 0x243   : > { %v1299_v57 = vmul.f32 %v1297_v49, %v1291_v48  ;;  %v2260_v48 = vld [vmem:[%s3562_s5 + $0x98] sm:$0xff] }
 0x244   : > { %v1298_v59 = vmul.f32 %v1296_v55, %v1290_v54  ;;  %v2720_v49 = vpack.c.bf16 %v2260_v48, %v2259_v47  ;;  %v2264_v54 = vld [vmem:[%s3562_s5 + $0xb0] sm:$0xff]  ;;  %v2265_v55 = vld [vmem:[%s3562_s5 + $0xb8] sm:$0xff] }
 0x245   : > { %v1306_v62 = vmul.f32 %v2239_v53, %v1299_v57  ;;  %v2726_v56 = vpack.c.bf16 %v2265_v55, %v2264_v54  ;;  %v2267_v57 = vld [vmem:[%s3562_s5 + $0xc0] sm:$0xff] }
 0x246   : > { %v1305_v60 = vmul.f32 %v2239_v53, %v1298_v59  ;;  %v2723_v53 = vpack.c.bf16 %v2263_v51, %v2262_v50 }
 0x247   : > { %v1313_v0 = vadd.f32 %v2240_v58, %v1306_v62  ;;  %v2269_v62 = vld [vmem:[%s3562_s5 + $0xd0] sm:$0xff] }
 0x248   : > { %v1312_v4 = vadd.f32 %v2240_v58, %v1305_v60  ;;  %v2268_v58 = vld [vmem:[%s3562_s5 + $0xc8] sm:$0xff] }
 0x249   : > { %v1325_v5 = vmul.f32 %v1321_v63, %v1313_v0  ;;  %v2729_v59 = vpack.c.bf16 %v2268_v58, %v2267_v57  ;;  %v2270_v63 = vld [vmem:[%s3562_s5 + $0xd8] sm:$0xff]  ;;  %v2272_v0 = vld [vmem:[%s3562_s5 + $0xe0] sm:$0xff] }
 0x24a   : > { %v1324_v7 = vmul.f32 %v1319_v61, %v1312_v4  ;;  %v2732_v60 = vpack.c.bf16 %v2270_v63, %v2269_v62  ;;  %v2273_v61 = vld [vmem:[%s3562_s5 + $0xe8] sm:$0xff]  ;;  %v2275_v4 = vld [vmem:[%s3562_s5 + $0xf8] sm:$0xff] }
 0x24b   : > { %2612 = vmatmul.mubr.msk.f32.vlgmr.msra.gmra.mrb[2].mxu1 %vm489_vm14, %v1325_v5  ;;  %v1338_v9 = vrot.slane %v1325_v5, 1  ;;  %v1490_v10 = vrot.slane %v1325_v5, 2  ;;  %v1571_v11 = vrot.slane %v1325_v5, 3  ;;  %v1652_v12 = vrot.slane %v1325_v5, 4 }
 0x24c   : > { %v1337_v13 = vrot.slane %v1324_v7, 1  ;;  %v1489_v14 = vrot.slane %v1324_v7, 2  ;;  %v1570_v15 = vrot.slane %v1324_v7, 3  ;;  %v1651_v16 = vrot.slane %v1324_v7, 4 }
 0x24d   : > { %v1732_v23 = vrot.slane %v1324_v7, 5  ;;  %v1733_v24 = vrot.slane %v1325_v5, 5  ;;  %v1813_v25 = vrot.slane %v1324_v7, 6  ;;  %v1814_v26 = vrot.slane %v1325_v5, 6 }
 0x24e   : > { %v1339_v27 = vsel %vm483_vm12, %v1337_v13, %v1338_v9  ;;  %v1491_v17 = vsel %vm653_vm13, %v1489_v14, %v1490_v10  ;;  %v1572_v28 = vsel %vm745_vm15, %v1570_v15, %v1571_v11  ;;  %v1653_v30 = vsel %vm353_vm1, %v1651_v16, %v1652_v12 }
 0x24f   : > { %2524 = vmatmul.mubr.msk.f32.vlgmr.msra.gmra.mrb[6].mxu0 %vm489_vm14, %v1339_v27  ;;  %v3371_v31 = vsel %vm928_vm2, %v1732_v23, %v1733_v24  ;;  %v3374_v18 = vsel %vm1020_vm3, %v1813_v25, %v1814_v26  ;;  %v1894_v29 = vrot.slane %v1324_v7, 7  ;;  %v1895_v32 = vrot.slane %v1325_v5, 7 }
 0x250   : > { %2700 = vmatpush3.bf16.msra.mxu0 %v2699_v8  ;;  %2534 = vmatprep.mubr.msk.f32.mxu0 %vm2947_vm0, %v2948_v6  ;;  %v2735_v2 = vpack.c.bf16 %v2273_v61, %v2272_v0  ;;  %v2738_v5 = vpack.c.bf16 %v2275_v4, %v2274_v52 }
 0x251   : > { %2701 = vmatprep.subr.bf16.mxu0 %v2946_v3  ;;  %v3386_v34 = vsel %vm1112_vm4, %v1894_v29, %v1895_v32  ;;  %v2282_v32 = vld [vmem:[%s3563_s6] ss:$0 sm:$0xff] }
 0x254   : > { %2703 = vmatpush3.bf16.msra.mxu0 %v2702_v1 }
 0x255   : > { %2704 = vmatprep.subr.bf16.mxu0 %v2946_v3 }
 0x257   : > { %2535 = vmatmul.mubr.msk.f32.vlgmr.msra.gmra.mrb[8].mxu0 %vm489_vm14, %v1324_v7 }
 0x258   : > { %2706 = vmatpush3.bf16.msra.mxu0 %v2705_v35  ;;  %2545 = vmatprep.mubr.msk.f32.mxu0 %vm2947_vm0, %v2948_v6 }
 0x259   : > { %2707 = vmatprep.subr.bf16.mxu0 %v2946_v3 }
 0x25c   : > { %2709 = vmatpush3.bf16.msra.mxu0 %v2708_v38 }
 0x25d   : > { %2710 = vmatprep.subr.bf16.mxu0 %v2946_v3 }
 0x25f   : > { %2546 = vmatmul.mubr.msk.f32.vlgmr.msra.gmra.mrb[10].mxu0 %vm489_vm14, %v1491_v17 }
 0x260   : > { %2712 = vmatpush3.bf16.msra.mxu0 %v2711_v40  ;;  %2556 = vmatprep.mubr.msk.f32.mxu0 %vm2947_vm0, %v2948_v6 }
 0x261   : > { %2713 = vmatprep.subr.bf16.mxu0 %v2946_v3 }
 0x264   : > { %2715 = vmatpush3.bf16.msra.mxu0 %v2714_v43 }
 0x265   : > { %2716 = vmatprep.subr.bf16.mxu0 %v2946_v3 }
 0x267   : > { %2557 = vmatmul.mubr.msk.f32.vlgmr.msra.gmra.mrb[12].mxu0 %vm489_vm14, %v1572_v28 }
 0x268   : > { %2718 = vmatpush3.bf16.msra.mxu0 %v2717_v46  ;;  %2567 = vmatprep.mubr.msk.f32.mxu0 %vm2947_vm0, %v2948_v6 }
 0x269   : > { %2719 = vmatprep.subr.bf16.mxu0 %v2946_v3 }
 0x26c   : > { %2721 = vmatpush3.bf16.msra.mxu0 %v2720_v49 }
 0x26d   : > { %2722 = vmatprep.subr.bf16.mxu0 %v2946_v3 }
 0x26f   : > { %2568 = vmatmul.mubr.msk.f32.vlgmr.msra.gmra.mrb[14].mxu0 %vm489_vm14, %v1653_v30 }
 0x270   : > { %2724 = vmatpush3.bf16.msra.mxu0 %v2723_v53  ;;  %2578 = vmatprep.mubr.msk.f32.mxu0 %vm2947_vm0, %v2948_v6 }
 0x271   : > { %2725 = vmatprep.subr.bf16.mxu0 %v2946_v3 }
 0x274   : > { %2727 = vmatpush3.bf16.msra.mxu0 %v2726_v56 }
 0x275   : > { %2728 = vmatprep.subr.bf16.mxu0 %v2946_v3 }
 0x277   : > { %2579 = vmatmul.mubr.msk.f32.vlgmr.msra.gmra.mrb[16].mxu0 %vm489_vm14, %v3371_v31 }
 0x278   : > { %2730 = vmatpush3.bf16.msra.mxu0 %v2729_v59  ;;  %2589 = vmatprep.mubr.msk.f32.mxu0 %vm2947_vm0, %v2948_v6 }
 0x279   : > { %2731 = vmatprep.subr.bf16.mxu0 %v2946_v3 }
 0x27c   : > { %2733 = vmatpush3.bf16.msra.mxu0 %v2732_v60 }
 0x27d   : > { %2734 = vmatprep.subr.bf16.mxu0 %v2946_v3 }
 0x27f   : > { %2590 = vmatmul.mubr.msk.f32.vlgmr.msra.gmra.mrb[18].mxu0 %vm489_vm14, %v3374_v18 }
 0x280   : > { %2736 = vmatpush3.bf16.msra.mxu0 %v2735_v2  ;;  %2600 = vmatprep.mubr.msk.f32.mxu0 %vm2947_vm0, %v2948_v6 }
 0x281   : > { %2737 = vmatprep.subr.bf16.mxu0 %v2946_v3 }
 0x284   : > { %2739 = vmatpush3.bf16.msra.mxu0 %v2738_v5 }
 0x287   : > { %2601 = vmatmul.mubr.msk.f32.vlgmr.msra.gmra.mrb[20].mxu0 %vm489_vm14, %v3386_v34 }
 0x31e   : > { %v2043_v7 = vpop.f32.mrb[2].mxu1 }
 0x31f   : > { %v2613_v8 = vpop.f32.mrb[3].mxu1 }
 0x322   : > { %v1408_v9 = vpop.f32.mrb[6].mxu0 }
 0x323   : > { %v2525_v10 = vpop.f32.mrb[7].mxu0 }
 0x32a   : > { %v1480_v11 = vpop.f32.mrb[8].mxu0 }
 0x32b   : > { %v1481_v12 = vadd.f32 %v1480_v11, %v1408_v9  ;;  %v2536_v13 = vpop.f32.mrb[9].mxu0 }
 0x332   : > { %v1560_v14 = vpop.f32.mrb[10].mxu0 }
 0x333   : > { %v1564_v15 = vadd.f32 %v1560_v14, %v1481_v12  ;;  %v2547_v16 = vpop.f32.mrb[11].mxu0 }
 0x33a   : > { %v1641_v21 = vpop.f32.mrb[12].mxu0 }
 0x33b   : > { %v1645_v22 = vadd.f32 %v1641_v21, %v1564_v15  ;;  %v2558_v23 = vpop.f32.mrb[13].mxu0 }
 0x342   : > { %v1722_v6 = vpop.f32.mrb[14].mxu0 }
 0x343   : > { %v1726_v24 = vadd.f32 %v1722_v6, %v1645_v22  ;;  %v2569_v3 = vpop.f32.mrb[15].mxu0 }
 0x34a   : > { %v1803_v25 = vpop.f32.mrb[16].mxu0 }
 0x34b   : > { %v1807_v26 = vadd.f32 %v1803_v25, %v1726_v24  ;;  %v2580_v27 = vpop.f32.mrb[17].mxu0 }
 0x352   : > { %v1884_v17 = vpop.f32.mrb[18].mxu0 }
 0x353   : > { %v1888_v28 = vadd.f32 %v1884_v17, %v1807_v26  ;;  %v2591_v30 = vpop.f32.mrb[19].mxu0 }
 0x35a   : > { %v1965_v31 = vpop.f32.mrb[20].mxu0 }
 0x35b   : > { %v1969_v18 = vadd.f32 %v1965_v31, %v1888_v28  ;;  %v2602_v29 = vpop.f32.mrb[21].mxu0 }
 0x35d   : > { %v2047_v1 = vadd.f32 %v2043_v7, %v1969_v18 }
 0x35f   : > { %v2053_v19 = vadd.f32 %v2282_v32, %v2047_v1 }
 0x361   : > { %v2055_v33 = vmul.f32 0.70710677, %v2053_v19  ;;  %v2054_v35 = vmul.f32 0.5, %v2053_v19 }
 0x363   : > { %2848 = verf.f32 %v2055_v33 }
 0x36d   : > { %v2849_v34 = vpop.eup %2848 }
 0x36e   : > { %v2057_v36 = vadd.f32 1.0, %v2849_v34 }
 0x370   : > { %v2058_v38 = vmul.f32 %v2057_v36, %v2054_v35 }
 0x372   : > { %v2064_v20 = vmul.f32 %v2283_v37, %v2058_v38 }
 0x374   : > { %v2070_v40 = vadd.f32 %v2284_v39, %v2064_v20 }
 0x376   : > { %2071 = vst.msk [vmem:[%s295_s22] sm:$0xff] %vm489_vm14, %v2070_v40 }
 0x377   : > { %2863 = shalt.err (!%p2860_p7)
}
 0x378   : > { %s2864_s0 = scalar_lea.hbm %s3503_s1, 128  ;;  %s2868_s18 = scalar_lea.hbm %s3564_s7, 512 }
 0x379   : > { %p2865_p9 = scmp.ne.s32.totalorder %s3503_s1, %s2864_s0  ;;  %p2869_p12 = scmp.lt.u32.totalorder %s3503_s1, %s3564_s7 }
 0x37a   : > { %p2870_p13 = scmp.lt.u32.totalorder %s2868_s18, %s2864_s0  ;;  %p2872_p1 = scmp.lt.u32.totalorder %s2864_s0, %s3503_s1 }
 0x37b   : > { %p2866_p10 = pnand %p2865_p9, %p3041_p3 }
 0x37c   : > { %p2871_p0 = por %p2870_p13, %p2869_p12 }
 0x37d   : > { %p2867_p11 = pneg %p2866_p10 }
 0x37e   : > { %p2873_p2 = por %p2872_p1, %p2871_p0 }
 0x380   : > { %p2874_p4 = pnand %p2873_p2, %p2867_p11 }
 0x382   : > { %2877 = shalt.err (!%p2874_p4)
}
 0x383   : > { %2764 = dma.vmem_to_hbm [thread:$0]  (%p3041_p3), %s3505_s23, 128, %s3503_s1, %s2073_s27  }
 0x384 PF: > { %p2770_p5 = scmp.ge.s32.totalorder %s2944_s8, 2  ;;  %s2100_s22 = sand.u32 1, %s2916_s24  }
 0x385   : > { %s2101_s28 = scalar_lea.sflag [#allocation3], %s2100_s22 }
 0x386   : > { %p2767_p6 = pnand %p2770_p5, %p3050_p8 }
 0x388   : > { %2911 = dma.done.wait (!%p2767_p6), %s2101_s28, 128  }
 0x389   : > { %2913 = vsyncadd (!%p2767_p6), %s2101_s28, 4294967168  ;;  %s20_s8 = sadd.s32 1, %s2944_s8   ;;  %s3573_s1 = sld [smem:[#allocation5_spill]] }
 0x38a   : > { %p17_p7 = scmp.ge.s32.totalorder %s20_s8, 6   ;;  %s3574_s24 = smov %s2920_s25 }
 0x38b   : > { %s3575_s25 = smov %s2924_s26  ;;  %s3576_s26 = smov %s3059_s19 }
 0x38c   : > { %s3577_s27 = smov %s2936_s29  ;;  %s3578_s28 = smov %s2940_s30 }
 0x38d   : > { %s3579_s29 = smov %s3582_s11  ;;  %19 = sbr.rel (!%p17_p7) target bundleno = 8 (0x8), region = 99 }
 0x38f   : > { %s3580_s30 = smov %s3573_s1 }
 0x394   :  { %2106 = vsyncpa [#allocation3], 1 }
 0x395   :  { %2108 = vsyncpa [#allocation3 + $0x1], 1 }

</bundles_post_ra>
